<compile_context>
chip_gen: v5e
topology: v5e:2x2
jax: 0.10.0
libtpu: 0.0.40
codegen_flags: <defaults>
</compile_context>

<pallas_src>
import numpy as np
import jax
import jax.numpy as jnp
from jax.experimental import pallas as pl
from jax.experimental.pallas import tpu as pltpu


# ----------------------------- Pallas kernel ------------------------------ #

def _td_kernel(x_ref, w_ref, b_ref, o_ref):
    # x_ref: (k, tm, c_in)   w_ref: (c_in, c_out_pad)   b_ref: (1, c_out_pad)
    # o_ref: (tm, c_out_pad)
    k = x_ref.shape[0]
    w = w_ref[...]                                   # resident (gamma-folded) weights
    acc = None
    for kk in range(k):                              # k is small & static -> unrolled
        xk = x_ref[kk].astype(jnp.float32)           # (tm, c_in)
        mu = jnp.mean(xk, axis=-1, keepdims=True)
        var = jnp.mean(jnp.square(xk - mu), axis=-1, keepdims=True)
        xn = ((xk - mu) * jax.lax.rsqrt(var + 1e-5)).astype(w.dtype)
        y = jnp.dot(xn, w, preferred_element_type=jnp.float32)   # 2-D MXU dot
        acc = y if acc is None else jnp.maximum(acc, y)          # MaxPool1d(k)
    # beta-derived bias is constant w.r.t. k -> add once after the max
    o_ref[...] = (acc + b_ref[...].astype(jnp.float32)).astype(o_ref.dtype)


def _round_up(x, m):
    return (x + m - 1) // m * m


def _choose_tile(m, k, c_in, c_out_pad, in_bytes, out_bytes, tm_req):
    tm = _round_up(max(1, min(tm_req, m)), 8)
    # Stay well inside v7x's 64 MiB VMEM: double-buffered in/out tiles <= ~24 MiB.
    budget = 24 * (1 << 20)

    def footprint(t):
        return 2 * (k * t * c_in * in_bytes + t * c_out_pad * out_bytes)

    while tm > 8 and footprint(tm) > budget:
        tm = _round_up(tm // 2, 8)
    # Keep >= 2 grid steps when possible so both v7x TensorCores get work.
    while tm > 8 and pl.cdiv(m, tm) < 2:
        tm = _round_up(tm // 2, 8)
    return tm


def norm_linear_maxpool(grouped_feats, gamma, beta, w_t, *, tm=512,
                        compute_dtype=jnp.bfloat16):
    """grouped_feats: (m, k, c_in) -> (m, c_out) via LN + Linear(no bias) + max over k."""
    m, k, c_in = grouped_feats.shape
    c_out = w_t.shape[1]
    out_dtype = jnp.float32

    # Fold LayerNorm affine params into the linear layer (algebraically identical):
    #   LN(x) @ W = ((x - mu) / sigma) @ (diag(gamma) @ W) + beta @ W
    w_fused = gamma.astype(jnp.float32)[:, None] * w_t.astype(jnp.float32)
    b_fused = beta.astype(jnp.float32) @ w_t.astype(jnp.float32)          # (c_out,)

    # Lane-dense output: pad the output dim to a multiple of 128, slice off after.
    c_pad = _round_up(c_out, 128)
    w_fused = jnp.pad(w_fused, ((0, 0), (0, c_pad - c_out))).astype(compute_dtype)
    b_fused = jnp.pad(b_fused, (0, c_pad - c_out)).reshape(1, c_pad)

    in_dtype = compute_dtype                       # bf16 HBM feed halves DMA traffic
    in_bytes = np.dtype(in_dtype).itemsize
    out_bytes = np.dtype(out_dtype).itemsize
    w_bytes = np.dtype(compute_dtype).itemsize

    tm_eff = _choose_tile(m, k, c_in, c_pad, in_bytes, out_bytes, tm)
    n_steps = pl.cdiv(m, tm_eff)
    m_pad = n_steps * tm_eff

    # k-major layout so each matmul has a dense (tm, c_in) sublane/lane tile.
    # TODO(synk): have the grouping gather emit (k, m, c_in) directly to skip this pass.
    x = jnp.swapaxes(grouped_feats, 0, 1).astype(in_dtype)                # (k, m, c_in)
    x = jnp.pad(x, ((0, 0), (0, m_pad - m), (0, 0)))

    cost = pl.CostEstimate(
        flops=2 * m * k * c_in * c_out,
        transcendentals=m * k,                       # one rsqrt per grouped row
        bytes_accessed=(m * k * c_in * in_bytes + c_in * c_pad * w_bytes
                        + m * c_out * out_bytes))

    tile_bytes = (2 * (k * tm_eff * c_in * in_bytes + tm_eff * c_pad * out_bytes)
                  + 2 * (c_in * c_pad * w_bytes + c_pad * 4))
    vmem_limit = int(min(max(4 * tile_bytes, 32 * (1 << 20)), 64 * (1 << 20)))

    out = pl.pallas_call(
        _td_kernel,
        out_shape=jax.ShapeDtypeStruct((m_pad, c_pad), out_dtype),
        grid=(n_steps,),
        in_specs=[
            pl.BlockSpec((k, tm_eff, c_in), lambda i: (0, i, 0)),
            pl.BlockSpec((c_in, c_pad), lambda i: (0, 0)),
            pl.BlockSpec((1, c_pad), lambda i: (0, 0)),
        ],
        out_specs=pl.BlockSpec((tm_eff, c_pad), lambda i: (i, 0)),
        compiler_params=pltpu.CompilerParams(
            dimension_semantics=("parallel",),
            vmem_limit_bytes=vmem_limit),
        cost_estimate=cost,
    )(x, w_fused, b_fused)
    return out[:m, :c_out]


# ------------------------- host-side glue (pointops) ----------------------- #
# TODO(synk): pointops.furthestsampling / queryandgroup are sequential,
# data-dependent gathers; implemented as numpy glue rather than in-kernel.

def compute_n_offset(offset, ratio):
    offset = np.asarray(offset)
    n_offset = [int(offset[0] * ratio) + 1]
    count = float(int(offset[0] * ratio) + 1)
    for i in range(1, offset.shape[0]):
        count += (offset[i] - offset[i - 1]) * ratio + 1
        n_offset.append(int(count))
    return np.array(n_offset, dtype=np.int32)


def furthest_point_sample(xyz, offset, n_offset):
    xyz = np.asarray(xyz)
    idx_all = []
    start, nstart = 0, 0
    for seg in range(len(offset)):
        end, nend = int(offset[seg]), int(n_offset[seg])
        pts = xyz[start:end]
        nsample = nend - nstart
        dist = np.full(pts.shape[0], 1e10, dtype=np.float64)
        sel = [0]
        for _ in range(1, nsample):
            d = np.sum((pts - pts[sel[-1]]) ** 2, axis=1)
            dist = np.minimum(dist, d)
            sel.append(int(np.argmax(dist)))
        idx_all.extend(start + s for s in sel)
        start, nstart = end, nend
    return np.array(idx_all, dtype=np.int32)


def knn_group(k, xyz, sample_idx, feats, offset, n_offset):
    xyz = np.asarray(xyz)
    feats = np.asarray(feats)
    groups = []
    start, nstart = 0, 0
    for seg in range(len(offset)):
        end, nend = int(offset[seg]), int(n_offset[seg])
        seg_xyz = xyz[start:end]
        seg_feats = feats[start:end]
        q = xyz[sample_idx[nstart:nend]]
        d2 = np.sum((q[:, None, :] - seg_xyz[None, :, :]) ** 2, axis=-1)
        nn = np.argsort(d2, axis=1)[:, :k]
        groups.append(seg_feats[nn])                 # (nq, k, c) -- use_xyz=False
        start, nstart = end, nend
    return np.concatenate(groups, axis=0)


# ------------------------------ module wrapper ----------------------------- #

def transition_down_v2_forward(pxo, params, *, ratio, k):
    xyz, feats, offset = pxo
    gamma, beta, w_t = params
    if ratio != 1:
        offset_np = np.asarray(offset)
        n_offset = compute_n_offset(offset_np, ratio)
        idx = furthest_point_sample(xyz, offset_np, n_offset)
        n_xyz = jnp.asarray(np.asarray(xyz)[idx])
        grouped = jnp.asarray(knn_group(k, xyz, idx, feats, offset_np, n_offset))
        out = norm_linear_maxpool(grouped, gamma, beta, w_t)
        return [n_xyz, out, jnp.asarray(n_offset)]
    else:
        grouped = feats[:, None, :]                  # (n, 1, c) -> max over 1 is identity
        out = norm_linear_maxpool(grouped, gamma, beta, w_t)
        return [xyz, out, offset]


def reference_forward(grouped, gamma, beta, w_t):
    x = grouped.astype(jnp.float32)
    mean = jnp.mean(x, axis=-1, keepdims=True)
    var = jnp.mean(jnp.square(x - mean), axis=-1, keepdims=True)
    xn = (x - mean) / jnp.sqrt(var + 1e-5) * gamma + beta
    y = jnp.einsum('mkc,cd->mkd', xn, w_t)
    return jnp.max(y, axis=1)


# ---------------------------------- main ----------------------------------- #

if __name__ == "__main__":
    key = jax.random.PRNGKey(0)
    k_xyz, k_feat, k_w, k_g, k_b = jax.random.split(key, 5)

    N = 32                 # total points (2 segments of 16)
    C_IN, C_OUT = 8, 16
    RATIO, K = 0.25, 4

    xyz = jax.random.normal(k_xyz, (N, 3), dtype=jnp.float32)
    feats = jax.random.normal(k_feat, (N, C_IN), dtype=jnp.float32)
    offset = jnp.array([16, 32], dtype=jnp.int32)

    # deterministic synthetic parameters
    w_t = 0.1 * jax.random.normal(k_w, (C_IN, C_OUT), dtype=jnp.float32)
    gamma = 1.0 + 0.05 * jax.random.normal(k_g, (C_IN,), dtype=jnp.float32)
    beta = 0.05 * jax.random.normal(k_b, (C_IN,), dtype=jnp.float32)

    n_xyz, out_feats, n_offset = transition_down_v2_forward(
        (xyz, feats, offset), (gamma, beta, w_t), ratio=RATIO, k=K)
    out_feats = jax.block_until_ready(out_feats)

    # correctness check vs plain-JAX f32 reference on the same grouped tensor
    # (kernel uses bf16 MXU operands / bf16 HBM feed -> compare at bf16 tolerance)
    offset_np = np.asarray(offset)
    n_off = compute_n_offset(offset_np, RATIO)
    idx = furthest_point_sample(xyz, offset_np, n_off)
    grouped = jnp.asarray(knn_group(K, xyz, idx, feats, offset_np, n_off))
    ref = reference_forward(grouped, gamma, beta, w_t)

    assert out_feats.shape == (int(n_off[-1]), C_OUT)
    np.testing.assert_allclose(np.asarray(out_feats), np.asarray(ref),
                               rtol=2e-2, atol=2e-2)
    print("KERNEL_OK")
</pallas_src>

<mosaic_0001>
module attributes {stable_mosaic.version = 11 : i64} {
  func.func @_td_kernel(%arg0: i32, %arg1: memref<4x8x8xbf16, #tpu.memory_space<vmem>>, %arg2: memref<8x128xbf16, #tpu.memory_space<vmem>>, %arg3: memref<1x128xf32, #tpu.memory_space<vmem>>, %arg4: memref<8x128xf32, #tpu.memory_space<vmem>>) attributes {dimension_semantics = [#tpu.dimension_semantics<parallel>], iteration_bounds = array<i64: 2>, scalar_prefetch = 0 : i64, scratch_operands = 0 : i64, tpu.core_type = #tpu.core_type<tc>, window_params = [{transform_indices = @transform_0, window_bounds = array<i64: 4, 8, 8>}, {pipeline_mode = #tpu.pipeline_mode<synchronous>, transform_indices = @transform_1, window_bounds = array<i64: 8, 128>}, {pipeline_mode = #tpu.pipeline_mode<synchronous>, transform_indices = @transform_2, window_bounds = array<i64: 1, 128>}, {transform_indices = @transform_3, window_bounds = array<i64: 8, 128>}]} {
    %c0 = arith.constant 0 : index
    %c0_0 = arith.constant 0 : index
    %0 = vector.load %arg2[%c0, %c0_0] : memref<8x128xbf16, #tpu.memory_space<vmem>>, vector<8x128xbf16>
    %c0_1 = arith.constant 0 : index
    %c0_2 = arith.constant 0 : index
    %c0_3 = arith.constant 0 : index
    %1 = vector.load %arg1[%c0_1, %c0_2, %c0_3] : memref<4x8x8xbf16, #tpu.memory_space<vmem>>, vector<1x8x8xbf16>
    %2 = vector.shape_cast %1 : vector<1x8x8xbf16> to vector<8x8xbf16>
    %3 = arith.extf %2 : vector<8x8xbf16> to vector<8x8xf32>
    %cst = arith.constant dense<0.000000e+00> : vector<8xf32>
    %4 = vector.multi_reduction <add>, %3, %cst [1] : vector<8x8xf32> to vector<8xf32>
    %5 = vector.shape_cast %4 : vector<8xf32> to vector<8x1xf32>
    %cst_4 = arith.constant 8.000000e+00 : f32
    %6 = vector.broadcast %cst_4 : f32 to vector<8x1xf32>
    %7 = arith.divf %5, %6 : vector<8x1xf32>
    %8 = vector.broadcast %7 : vector<8x1xf32> to vector<8x8xf32>
    %9 = arith.subf %3, %8 : vector<8x8xf32>
    %10 = arith.mulf %9, %9 : vector<8x8xf32>
    %cst_5 = arith.constant dense<0.000000e+00> : vector<8xf32>
    %11 = vector.multi_reduction <add>, %10, %cst_5 [1] : vector<8x8xf32> to vector<8xf32>
    %12 = vector.shape_cast %11 : vector<8xf32> to vector<8x1xf32>
    %cst_6 = arith.constant 8.000000e+00 : f32
    %13 = vector.broadcast %cst_6 : f32 to vector<8x1xf32>
    %14 = arith.divf %12, %13 : vector<8x1xf32>
    %15 = vector.broadcast %7 : vector<8x1xf32> to vector<8x8xf32>
    %16 = arith.subf %3, %15 : vector<8x8xf32>
    %cst_7 = arith.constant 9.99999974E-6 : f32
    %17 = vector.broadcast %cst_7 : f32 to vector<8x1xf32>
    %18 = arith.addf %14, %17 : vector<8x1xf32>
    %19 = math.rsqrt %18 : vector<8x1xf32>
    %20 = vector.broadcast %19 : vector<8x1xf32> to vector<8x8xf32>
    %21 = arith.mulf %16, %20 : vector<8x8xf32>
    %22 = arith.truncf %21 : vector<8x8xf32> to vector<8x8xbf16>
    %cst_8 = arith.constant dense<0.000000e+00> : vector<8x128xf32>
    %23 = tpu.matmul %22, %0, %cst_8 {dimension_numbers = #tpu.dot_dimension_numbers<[1], [0], [0], [1], [0, 0, 1, 1], [], []>} : vector<8x8xbf16>, vector<8x128xbf16>, vector<8x128xf32> -> vector<8x128xf32>
    %c1 = arith.constant 1 : index
    %c0_9 = arith.constant 0 : index
    %c0_10 = arith.constant 0 : index
    %24 = vector.load %arg1[%c1, %c0_9, %c0_10] : memref<4x8x8xbf16, #tpu.memory_space<vmem>>, vector<1x8x8xbf16>
    %25 = vector.shape_cast %24 : vector<1x8x8xbf16> to vector<8x8xbf16>
    %26 = arith.extf %25 : vector<8x8xbf16> to vector<8x8xf32>
    %cst_11 = arith.constant dense<0.000000e+00> : vector<8xf32>
    %27 = vector.multi_reduction <add>, %26, %cst_11 [1] : vector<8x8xf32> to vector<8xf32>
    %28 = vector.shape_cast %27 : vector<8xf32> to vector<8x1xf32>
    %cst_12 = arith.constant 8.000000e+00 : f32
    %29 = vector.broadcast %cst_12 : f32 to vector<8x1xf32>
    %30 = arith.divf %28, %29 : vector<8x1xf32>
    %31 = vector.broadcast %30 : vector<8x1xf32> to vector<8x8xf32>
    %32 = arith.subf %26, %31 : vector<8x8xf32>
    %33 = arith.mulf %32, %32 : vector<8x8xf32>
    %cst_13 = arith.constant dense<0.000000e+00> : vector<8xf32>
    %34 = vector.multi_reduction <add>, %33, %cst_13 [1] : vector<8x8xf32> to vector<8xf32>
    %35 = vector.shape_cast %34 : vector<8xf32> to vector<8x1xf32>
    %cst_14 = arith.constant 8.000000e+00 : f32
    %36 = vector.broadcast %cst_14 : f32 to vector<8x1xf32>
    %37 = arith.divf %35, %36 : vector<8x1xf32>
    %38 = vector.broadcast %30 : vector<8x1xf32> to vector<8x8xf32>
    %39 = arith.subf %26, %38 : vector<8x8xf32>
    %cst_15 = arith.constant 9.99999974E-6 : f32
    %40 = vector.broadcast %cst_15 : f32 to vector<8x1xf32>
    %41 = arith.addf %37, %40 : vector<8x1xf32>
    %42 = math.rsqrt %41 : vector<8x1xf32>
    %43 = vector.broadcast %42 : vector<8x1xf32> to vector<8x8xf32>
    %44 = arith.mulf %39, %43 : vector<8x8xf32>
    %45 = arith.truncf %44 : vector<8x8xf32> to vector<8x8xbf16>
    %cst_16 = arith.constant dense<0.000000e+00> : vector<8x128xf32>
    %46 = tpu.matmul %45, %0, %cst_16 {dimension_numbers = #tpu.dot_dimension_numbers<[1], [0], [0], [1], [0, 0, 1, 1], [], []>} : vector<8x8xbf16>, vector<8x128xbf16>, vector<8x128xf32> -> vector<8x128xf32>
    %47 = arith.maximumf %23, %46 : vector<8x128xf32>
    %c2 = arith.constant 2 : index
    %c0_17 = arith.constant 0 : index
    %c0_18 = arith.constant 0 : index
    %48 = vector.load %arg1[%c2, %c0_17, %c0_18] : memref<4x8x8xbf16, #tpu.memory_space<vmem>>, vector<1x8x8xbf16>
    %49 = vector.shape_cast %48 : vector<1x8x8xbf16> to vector<8x8xbf16>
    %50 = arith.extf %49 : vector<8x8xbf16> to vector<8x8xf32>
    %cst_19 = arith.constant dense<0.000000e+00> : vector<8xf32>
    %51 = vector.multi_reduction <add>, %50, %cst_19 [1] : vector<8x8xf32> to vector<8xf32>
    %52 = vector.shape_cast %51 : vector<8xf32> to vector<8x1xf32>
    %cst_20 = arith.constant 8.000000e+00 : f32
    %53 = vector.broadcast %cst_20 : f32 to vector<8x1xf32>
    %54 = arith.divf %52, %53 : vector<8x1xf32>
    %55 = vector.broadcast %54 : vector<8x1xf32> to vector<8x8xf32>
    %56 = arith.subf %50, %55 : vector<8x8xf32>
    %57 = arith.mulf %56, %56 : vector<8x8xf32>
    %cst_21 = arith.constant dense<0.000000e+00> : vector<8xf32>
    %58 = vector.multi_reduction <add>, %57, %cst_21 [1] : vector<8x8xf32> to vector<8xf32>
    %59 = vector.shape_cast %58 : vector<8xf32> to vector<8x1xf32>
    %cst_22 = arith.constant 8.000000e+00 : f32
    %60 = vector.broadcast %cst_22 : f32 to vector<8x1xf32>
    %61 = arith.divf %59, %60 : vector<8x1xf32>
    %62 = vector.broadcast %54 : vector<8x1xf32> to vector<8x8xf32>
    %63 = arith.subf %50, %62 : vector<8x8xf32>
    %cst_23 = arith.constant 9.99999974E-6 : f32
    %64 = vector.broadcast %cst_23 : f32 to vector<8x1xf32>
    %65 = arith.addf %61, %64 : vector<8x1xf32>
    %66 = math.rsqrt %65 : vector<8x1xf32>
    %67 = vector.broadcast %66 : vector<8x1xf32> to vector<8x8xf32>
    %68 = arith.mulf %63, %67 : vector<8x8xf32>
    %69 = arith.truncf %68 : vector<8x8xf32> to vector<8x8xbf16>
    %cst_24 = arith.constant dense<0.000000e+00> : vector<8x128xf32>
    %70 = tpu.matmul %69, %0, %cst_24 {dimension_numbers = #tpu.dot_dimension_numbers<[1], [0], [0], [1], [0, 0, 1, 1], [], []>} : vector<8x8xbf16>, vector<8x128xbf16>, vector<8x128xf32> -> vector<8x128xf32>
    %71 = arith.maximumf %47, %70 : vector<8x128xf32>
    %c3 = arith.constant 3 : index
    %c0_25 = arith.constant 0 : index
    %c0_26 = arith.constant 0 : index
    %72 = vector.load %arg1[%c3, %c0_25, %c0_26] : memref<4x8x8xbf16, #tpu.memory_space<vmem>>, vector<1x8x8xbf16>
    %73 = vector.shape_cast %72 : vector<1x8x8xbf16> to vector<8x8xbf16>
    %74 = arith.extf %73 : vector<8x8xbf16> to vector<8x8xf32>
    %cst_27 = arith.constant dense<0.000000e+00> : vector<8xf32>
    %75 = vector.multi_reduction <add>, %74, %cst_27 [1] : vector<8x8xf32> to vector<8xf32>
    %76 = vector.shape_cast %75 : vector<8xf32> to vector<8x1xf32>
    %cst_28 = arith.constant 8.000000e+00 : f32
    %77 = vector.broadcast %cst_28 : f32 to vector<8x1xf32>
    %78 = arith.divf %76, %77 : vector<8x1xf32>
    %79 = vector.broadcast %78 : vector<8x1xf32> to vector<8x8xf32>
    %80 = arith.subf %74, %79 : vector<8x8xf32>
    %81 = arith.mulf %80, %80 : vector<8x8xf32>
    %cst_29 = arith.constant dense<0.000000e+00> : vector<8xf32>
    %82 = vector.multi_reduction <add>, %81, %cst_29 [1] : vector<8x8xf32> to vector<8xf32>
    %83 = vector.shape_cast %82 : vector<8xf32> to vector<8x1xf32>
    %cst_30 = arith.constant 8.000000e+00 : f32
    %84 = vector.broadcast %cst_30 : f32 to vector<8x1xf32>
    %85 = arith.divf %83, %84 : vector<8x1xf32>
    %86 = vector.broadcast %78 : vector<8x1xf32> to vector<8x8xf32>
    %87 = arith.subf %74, %86 : vector<8x8xf32>
    %cst_31 = arith.constant 9.99999974E-6 : f32
    %88 = vector.broadcast %cst_31 : f32 to vector<8x1xf32>
    %89 = arith.addf %85, %88 : vector<8x1xf32>
    %90 = math.rsqrt %89 : vector<8x1xf32>
    %91 = vector.broadcast %90 : vector<8x1xf32> to vector<8x8xf32>
    %92 = arith.mulf %87, %91 : vector<8x8xf32>
    %93 = arith.truncf %92 : vector<8x8xf32> to vector<8x8xbf16>
    %cst_32 = arith.constant dense<0.000000e+00> : vector<8x128xf32>
    %94 = tpu.matmul %93, %0, %cst_32 {dimension_numbers = #tpu.dot_dimension_numbers<[1], [0], [0], [1], [0, 0, 1, 1], [], []>} : vector<8x8xbf16>, vector<8x128xbf16>, vector<8x128xf32> -> vector<8x128xf32>
    %95 = arith.maximumf %71, %94 : vector<8x128xf32>
    %c0_33 = arith.constant 0 : index
    %c0_34 = arith.constant 0 : index
    %96 = vector.load %arg3[%c0_33, %c0_34] : memref<1x128xf32, #tpu.memory_space<vmem>>, vector<1x128xf32>
    %97 = vector.broadcast %96 : vector<1x128xf32> to vector<8x128xf32>
    %98 = arith.addf %95, %97 : vector<8x128xf32>
    %c0_35 = arith.constant 0 : index
    %c0_36 = arith.constant 0 : index
    %99 = vector.load %arg4[%c0_35, %c0_36] : memref<8x128xf32, #tpu.memory_space<vmem>>, vector<8x128xf32>
    tpu.vector_store %arg4[%c0_35, %c0_36], %98 {strides = array<i32>} : memref<8x128xf32, #tpu.memory_space<vmem>>, vector<8x128xf32>,
    return
  }
  func.func @transform_0(%arg0: i32) -> (i32, i32, i32) {
    %c0_i32 = arith.constant 0 : i32
    %c0_i32_0 = arith.constant 0 : i32
    %c0_i32_1 = arith.constant 0 : i32
    return %c0_i32, %arg0, %c0_i32_0 : i32, i32, i32
  }
  func.func @transform_1(%arg0: i32) -> (i32, i32) {
    %c0_i32 = arith.constant 0 : i32
    %c0_i32_0 = arith.constant 0 : i32
    %c0_i32_1 = arith.constant 0 : i32
    return %c0_i32, %c0_i32_0 : i32, i32
  }
  func.func @transform_2(%arg0: i32) -> (i32, i32) {
    %c0_i32 = arith.constant 0 : i32
    %c0_i32_0 = arith.constant 0 : i32
    %c0_i32_1 = arith.constant 0 : i32
    return %c0_i32, %c0_i32_0 : i32, i32
  }
  func.func @transform_3(%arg0: i32) -> (i32, i32) {
    %c0_i32 = arith.constant 0 : i32
    %c0_i32_0 = arith.constant 0 : i32
    return %arg0, %c0_i32 : i32, i32
  }
}

</mosaic_0001>

<bundles_post_ra>
// kernel: tpu_custom_call.1
= control target key start
LH: loop header
LB: loop body
LE: loop exit
PB: predicated region body
PF: predicated region fallthrough
CT: control target
= control target key end

     0   :  { %8 = vsyncpa [#allocation4], 0  ;;  %s783_s0 = inlined_call_operand.vmem [shape: bf16[4,16,8], index: 0, kind: input, shape index: {}]   ;;  %s784_s1 = inlined_call_operand.vmem [shape: bf16[8,128], index: 1, kind: input, shape index: {}]   ;;  %s785_s2 = inlined_call_operand.vmem [shape: f32[1,128], index: 2, kind: input, shape index: {}]   ;;  %s786_s3 = inlined_call_operand.hbm [shape: f32[16,128], index: 3, kind: output, shape index: {}]  }
   0x1   :  { %10 = vsyncpa [#allocation4 + $0x1], 0  ;;  %s650_s12 = smov 0   ;;  %s652_s13 = smov 0  }
   0x2   :  { %s654_s14 = smov 0   ;;  %s656_s15 = smov 0  }
   0x3 LB: > { %s494_s16 = sadd.s32 4294967295, %s627_s15   ;;  %s495_s17 = sadd.s32 4294967294, %s627_s15   ;;  %s627_s15 = sphi %s656_s15, %s792_s15   ;;  %s623_s14 = sphi %s654_s14, %s791_s14   ;;  %s619_s13 = sphi %s652_s13, %s790_s13   ;;  %s615_s12 = sphi %s650_s12, %s789_s12  }
   0x4   : > { %s673_s18 = sadd.s32 1, %s627_s15   ;;  %s23_s19 = sadd.s32 1, %s623_s14 }
   0x5   : > { %s20_s20 = ssub.s32 %s627_s15, %s673_s18  ;;  %p30_p0 = scmp.ne.s32.totalorder %s623_s14, %s619_s13 }
   0x6   : > { %p21_p1 = scmp.eq.s32.totalorder %s20_s20, 0  ;;  %p31_p2 = scmp.eq.s32.totalorder %s627_s15, 0 }
   0x7   : > { %p102_p3 = scmp.eq.s32.totalorder %s494_s16, 1  ;;  %p107_p4 = scmp.ne.s32.totalorder %s619_s13, %s615_s12 }
   0x8   : > { %s686_s21 = scalar_select %p21_p1, %s623_s14, %s23_s19  }
   0x9   : > { %p32_p5 = por %p31_p2, %p30_p0  ;;  %p688_p6 = por %p102_p3, %p30_p0 }
   0xa   : > { %p108_p7 = scmp.eq.s32.totalorder %s495_s17, 1  ;;  %p497_p9 = scmp.ge.s32.totalorder %s627_s15, 2 }
   0xc   : > { %p692_p8 = por %p108_p7, %p107_p4  ;;  %130 = sbr.rel (%p497_p9) target bundleno = 25 (0x19), region = 24 }
  0x11   : > { %133 = sbr.rel (!%p32_p5) target bundleno = 25 (0x19), region = 28  ;;  %s135_s24 = sand.u32 (%p32_p5), 1, %s623_s14  }
  0x12   : > { %s499_s25 = sshll.u32 (%p32_p5), %s627_s15, 2  ;;  %s498_s26 = sshll.u32 (%p32_p5), %s135_s24, 4 }
  0x13   : > { %s139_s29 = scalar_lea.vmem (%p32_p5), %s783_s0, %s499_s25  ;;  %s137_s30 = scalar_lea.vmem (%p32_p5), [#allocation2], %s498_s26 }
  0x14   : > { %v156_v0 = vld [vmem:[%s139_s29] sm:$0xf] (%p32_p5)  ;;  %v158_v1 = vld [vmem:[%s139_s29 + $0x8] sm:$0xf] (%p32_p5)  ;;  %v160_v2 = vld [vmem:[%s139_s29 + $0x10] sm:$0xf] (%p32_p5) }
  0x15   : > { %157 = vst [vmem:[%s137_s30] sm:$0xf] (%p32_p5), %v156_v0  ;;  %v162_v3 = vld [vmem:[%s139_s29 + $0x18] sm:$0xf] (%p32_p5) }
  0x16   : > { %159 = vst [vmem:[%s137_s30 + $0x4] sm:$0xf] %v158_v1 }
  0x17   : > { %161 = vst [vmem:[%s137_s30 + $0x8] sm:$0xf] %v160_v2 }
  0x18   : > { %163 = vst [vmem:[%s137_s30 + $0xc] sm:$0xf] %v162_v3 }
  0x19 PF: > { %p500_p10 = scmp.ge.s32.totalorder %s627_s15, 1  ;;  %p194_p11 = scmp.lt.s32.totalorder %s627_s15, 3 }
  0x1b   : > { %p195_p12 = pnand %p500_p10, %p194_p11 }
  0x1c   : > { %s707_s4 = sand.u32 (!%p195_p12), 1, %s619_s13   ;;  %s511_s10 = sshll.u32 (!%p195_p12), %s494_s16, 3 }
  0x1d   : > { %198 = sbr.rel (%p195_p12) target bundleno = 451 (0x1c3), region = 69  ;;  %s501_s5 = sshll.u32 (!%p195_p12), %s707_s4, 4 }
  0x1e   : > { %s203_s6 = scalar_lea.vmem (!%p195_p12), [#allocation2], %s501_s5  ;;  %s502_s9 = sshll.u32 (!%p195_p12), %s707_s4, 3 }
  0x1f   : > { %s425_s19 = scalar_lea.hbm (!%p195_p12), %s786_s3, %s511_s10  ;;  %s223_s25 = scalar_lea.vmem (!%p195_p12), [#allocation3], %s502_s9 }
  0x20   : > { %s427_s26 = sshll.u32 (!%p195_p12), %s223_s25, 4  ;;  %s429_s27 = sshll.u32 (!%p195_p12), %s425_s19, 4  ;;  %s428_s26 = int_to_ptr.vmem [resolvable:$true] %s427_s26  ;;  %s430_s27 = int_to_ptr.hbm [resolvable:$true] %s429_s27 }
  0x21   : > { %s415_s16 = scalar_lea.sflag (!%p195_p12), [#allocation4], %s707_s4  ;;  %s579_s28 = sshra.s32 (!%p195_p12), %s430_s27, 4  ;;  %s580_s28 = int_to_ptr.hbm [resolvable:$true] %s579_s28 }
  0x22   : > { %vm228_vm0 = vcmask 64512   ;;  %v506_v4 = vld [vmem:[%s203_s6 + $0x8] sm:$0xff]   ;;  %v226_v5 = vld [vmem:[%s203_s6] sm:$0xff]   ;;  %v629_v14 = vmov 8.0   ;;  %vm262_vm2 = vcmask 1043456   ;;  %s581_s29 = scalar_lea.hbm %s580_s28, 8  ;;  %p586_p2 = scmp.lt.s32.totalorder %s580_s28, %s786_s3 }
  0x23   : > { %v324_v6 = vunpack.c.l.bf16 %v506_v4  ;;  %v227_v7 = vunpack.c.l.bf16 %v226_v5  ;;  %v367_v10 = vunpack.c.h.bf16 %v506_v4  ;;  %v281_v11 = vunpack.c.h.bf16 %v226_v5  ;;  %v225_v41 = vld [vmem:[%s784_s1] sm:$0xf]  ;;  %p582_p13 = scmp.ne.s32.totalorder %s580_s28, %s581_s29  ;;  %s585_s6 = scalar_lea.hbm %s786_s3, 16 }
  0x24   : > { %555 = vrcp.f32 %v629_v14  ;;  %v264_v42 = vsel %vm262_vm2, %v225_v41, 0  ;;  %p587_p3 = scmp.lt.s32.totalorder %s585_s6, %s581_s29 }
  0x25   : > { %v325_v8 = vsel %vm228_vm0, %v324_v6, 0.0  ;;  %v229_v9 = vsel %vm228_vm0, %v227_v7, 0.0  ;;  %v368_v12 = vsel %vm228_vm0, %v367_v10, 0.0  ;;  %v282_v13 = vsel %vm228_vm0, %v281_v11, 0.0  ;;  %273 = vmatpush.bf16.msra.mxu0 %v264_v42  ;;  %358 = vmatpush.bf16.msra.mxu2 %v264_v42  ;;  %p583_p0 = pnand %p582_p13, %p688_p6 }
  0x26   : > { %326 = vadd.xlane.f32.xlu0 %v325_v8  ;;  %230 = vadd.xlane.f32.xlu1 %v229_v9  ;;  %p588_p4 = por %p587_p3, %p586_p2 }
  0x27   : > { %315 = vmatpush.bf16.msra.mxu1 %v264_v42  ;;  %401 = vmatpush.bf16.msra.mxu3 %v264_v42  ;;  %p584_p1 = pneg %p583_p0 }
  0x29   : > { %p589_p5 = pnand %p588_p4, %p584_p1 }
  0x2a   : > { %v556_v15 = vpop.eup %555 }
  0x2b   : > { %v233_v16 = vmul.f32 8.0, %v556_v15  ;;  %vm237_vm1 = vweird.f32 %v556_v15 }
  0x2d   : > { %v234_v17 = vsub.f32 1.0, %v233_v16 }
  0x2e   : > { %369 = vadd.xlane.f32.xlu0 %v368_v12  ;;  %283 = vadd.xlane.f32.xlu1 %v282_v13 }
  0x2f   : > { %v235_v18 = vmul.f32 %v556_v15, %v234_v17 }
  0x31   : > { %v236_v19 = vadd.f32 %v556_v15, %v235_v18 }
  0x33   : > { %v238_v20 = vsel %vm237_vm1, %v556_v15, %v236_v19 }
  0x99   : > { %v327_v21 = vpop.xlane.xlu0 %326  ;;  %v231_v22 = vpop.xlane.xlu1 %230 }
  0x9a   : > { %v328_v23 = vmul.f32 %v327_v21, %v238_v20  ;;  %v239_v24 = vmul.f32 %v238_v20, %v231_v22 }
  0x9c   : > { %v714_v25 = vsub.f32 %v324_v6, %v328_v23  ;;  %v716_v26 = vsub.f32 %v227_v7, %v239_v24 }
  0x9e   : > { %v330_v27 = vmul.f32 %v714_v25, %v714_v25  ;;  %v241_v28 = vmul.f32 %v716_v26, %v716_v26 }
  0xa0   : > { %v331_v29 = vsel %vm228_vm0, %v330_v27, 0.0  ;;  %v242_v30 = vsel %vm228_vm0, %v241_v28, 0.0 }
  0xa1   : > { %332 = vadd.xlane.f32.xlu2 %v331_v29  ;;  %v370_v31 = vpop.xlane.xlu0 %369  ;;  %243 = vadd.xlane.f32.xlu0 %v242_v30  ;;  %v284_v32 = vpop.xlane.xlu1 %283 }
  0xa2   : > { %v371_v33 = vmul.f32 %v370_v31, %v238_v20  ;;  %v285_v34 = vmul.f32 %v284_v32, %v238_v20 }
  0xa4   : > { %v724_v35 = vsub.f32 %v367_v10, %v371_v33  ;;  %v726_v36 = vsub.f32 %v281_v11, %v285_v34  ;;  %v554_v33 = vld [vmem:[%s785_s2] ss:$0 sm:$0xff] }
  0xa6   : > { %v373_v37 = vmul.f32 %v724_v35, %v724_v35  ;;  %v287_v38 = vmul.f32 %v726_v36, %v726_v36 }
  0xa8   : > { %v374_v39 = vsel %vm228_vm0, %v373_v37, 0.0  ;;  %v288_v40 = vsel %vm228_vm0, %v287_v38, 0.0 }
  0xa9   : > { %375 = vadd.xlane.f32.xlu2 %v374_v39  ;;  %289 = vadd.xlane.f32.xlu1 %v288_v40 }
 0x114   : > { %v333_v43 = vpop.xlane.xlu2 %332  ;;  %v244_v44 = vpop.xlane.xlu0 %243 }
 0x115   : > { %v334_v45 = vmul.f32 %v333_v43, %v238_v20  ;;  %v245_v46 = vmul.f32 %v244_v44, %v238_v20 }
 0x117   : > { %v335_v47 = vadd.f32 1e-05, %v334_v45  ;;  %v246_v48 = vadd.f32 1e-05, %v245_v46 }
 0x119   : > { %557 = vrsqrt.f32 %v335_v47  ;;  %vm342_vm5 = vweird.f32 %v335_v47  ;;  %vm253_vm7 = vweird.f32 %v246_v48 }
 0x11a   : > { %559 = vrsqrt.f32 %v246_v48 }
 0x11c   : > { %v376_v49 = vpop.xlane.xlu2 %375  ;;  %v290_v50 = vpop.xlane.xlu1 %289 }
 0x11d   : > { %v377_v51 = vmul.f32 %v376_v49, %v238_v20  ;;  %v291_v52 = vmul.f32 %v290_v50, %v238_v20 }
 0x11f   : > { %v558_v53 = vpop.eup %557  ;;  %v378_v54 = vadd.f32 1e-05, %v377_v51  ;;  %v292_v55 = vadd.f32 1e-05, %v291_v52 }
 0x120   : > { %v560_v56 = vpop.eup %559  ;;  %v337_v57 = vmul.f32 %v558_v53, %v335_v47  ;;  %vm343_vm3 = vweird.f32 %v558_v53 }
 0x121   : > { %v248_v58 = vmul.f32 %v560_v56, %v246_v48  ;;  %561 = vrsqrt.f32 %v378_v54  ;;  %vm254_vm4 = vweird.f32 %v560_v56  ;;  %vm344_vm6 = vmor %vm342_vm5, %vm343_vm3  ;;  %vm385_vm11 = vweird.f32 %v378_v54 }
 0x122   : > { %v338_v59 = vmul.f32 %v558_v53, %v337_v57  ;;  %563 = vrsqrt.f32 %v292_v55  ;;  %vm255_vm8 = vmor %vm253_vm7, %vm254_vm4  ;;  %vm299_vm13 = vweird.f32 %v292_v55 }
 0x123   : > { %v249_v60 = vmul.f32 %v560_v56, %v248_v58 }
 0x124   : > { %v339_v61 = vmul.f32 0.5, %v338_v59 }
 0x125   : > { %v250_v62 = vmul.f32 0.5, %v249_v60 }
 0x126   : > { %v340_v63 = vsub.f32 1.5, %v339_v61 }
 0x127   : > { %v562_v0 = vpop.eup %561  ;;  %v251_v1 = vsub.f32 1.5, %v250_v62 }
 0x128   : > { %v564_v2 = vpop.eup %563  ;;  %v380_v3 = vmul.f32 %v562_v0, %v378_v54  ;;  %v341_v4 = vmul.f32 %v558_v53, %v340_v63  ;;  %vm386_vm9 = vweird.f32 %v562_v0 }
 0x129   : > { %v294_v5 = vmul.f32 %v564_v2, %v292_v55  ;;  %v252_v6 = vmul.f32 %v560_v56, %v251_v1  ;;  %vm300_vm10 = vweird.f32 %v564_v2  ;;  %vm387_vm12 = vmor %vm385_vm11, %vm386_vm9 }
 0x12a   : > { %v381_v7 = vmul.f32 %v562_v0, %v380_v3  ;;  %v345_v8 = vsel %vm344_vm6, %v558_v53, %v341_v4  ;;  %vm301_vm14 = vmor %vm299_vm13, %vm300_vm10 }
 0x12b   : > { %v295_v9 = vmul.f32 %v564_v2, %v294_v5  ;;  %v256_v10 = vsel %vm255_vm8, %v560_v56, %v252_v6  ;;  %v346_v11 = vmul.f32 %v345_v8, %v714_v25 }
 0x12c   : > { %v382_v12 = vmul.f32 0.5, %v381_v7  ;;  %v257_v13 = vmul.f32 %v256_v10, %v716_v26 }
 0x12d   : > { %v296_v14 = vmul.f32 0.5, %v295_v9  ;;  %v347_v15 = vpack.c.bf16 %v346_v11, %v346_v11 }
 0x12e   : > { %v383_v16 = vsub.f32 1.5, %v382_v12  ;;  %v258_v17 = vpack.c.bf16 %v257_v13, %v257_v13 }
 0x12f   : > { %v297_v18 = vsub.f32 1.5, %v296_v14  ;;  %507 = vmatmul.msk.bf16.vlgmr.msra.gmra.mxu2 %vm228_vm0, %v347_v15 }
 0x130   : > { %503 = vmatmul.msk.bf16.vlgmr.msra.gmra.mxu0 %vm228_vm0, %v258_v17  ;;  %v384_v19 = vmul.f32 %v562_v0, %v383_v16 }
 0x131   : > { %v298_v20 = vmul.f32 %v564_v2, %v297_v18 }
 0x132   : > { %v388_v21 = vsel %vm387_vm12, %v562_v0, %v384_v19 }
 0x133   : > { %v302_v22 = vsel %vm301_vm14, %v564_v2, %v298_v20  ;;  %v389_v23 = vmul.f32 %v388_v21, %v724_v35 }
 0x134   : > { %v303_v24 = vmul.f32 %v302_v22, %v726_v36 }
 0x135   : > { %v390_v25 = vpack.c.bf16 %v389_v23, %v389_v23 }
 0x136   : > { %v304_v26 = vpack.c.bf16 %v303_v24, %v303_v24 }
 0x137   : > { %509 = vmatmul.msk.bf16.vlgmr.msra.gmra.mxu3 %vm228_vm0, %v390_v25 }
 0x138   : > { %505 = vmatmul.msk.bf16.vlgmr.msra.gmra.mxu1 %vm228_vm0, %v304_v26 }
 0x1ad   : > { %v275_v27 = vpop.f32.mrf.mxu0 }
 0x1b2   : > { %v360_v28 = vpop.f32.mrf.mxu2 }
 0x1b5   : > { %v277_v29 = vpop.f32.mrf.mxu0  ;;  %v317_v30 = vpop.f32.mrf.mxu1 }
 0x1b6   : > { %v321_v31 = vmax.f32 %v275_v27, %v317_v30 }
 0x1b8   : > { %v364_v32 = vmax.f32 %v321_v31, %v360_v28 }
 0x1ba   : > { %v362_v34 = vpop.f32.mrf.mxu2  ;;  %v403_v35 = vpop.f32.mrf.mxu3 }
 0x1bb   : > { %v407_v36 = vmax.f32 %v364_v32, %v403_v35 }
 0x1bd   : > { %v412_v37 = vadd.f32 %v554_v33, %v407_v36  ;;  %v319_v38 = vpop.f32.mrf.mxu1 }
 0x1bf   : > { %413 = vst [vmem:[%s223_s25] sm:$0xff] %v412_v37 }
 0x1c0   : > { %592 = shalt.err (!%p589_p5)
}
 0x1c1   : > { %514 = dma.vmem_to_hbm [thread:$0]  (%p688_p6), %s428_s26, 128, %s430_s27, %s415_s16  }
 0x1c2   : > { %v405_v39 = vpop.f32.mrf.mxu3 }
 0x1c3 PF: > { %s441_s4 = sand.u32 1, %s615_s12   ;;  %p517_p7 = pnand %p497_p9, %p692_p8 }
 0x1c4   : > { %s442_s9 = scalar_lea.sflag [#allocation4], %s441_s4 }
 0x1c5   : > { %p518_p10 = pneg %p517_p7 }
 0x1c7   : > { %610 = dma.done.wait (%p518_p10), %s442_s9, 128  }
 0x1c8   : > { %612 = vsyncadd (%p518_p10), %s442_s9, 4294967168  ;;  %p13_p11 = scmp.ge.s32.totalorder %s673_s18, 4   ;;  %s789_s12 = smov %s619_s13 }
 0x1c9   : > { %s790_s13 = smov %s623_s14  ;;  %s791_s14 = smov %s686_s21 }
 0x1ca   : > { %s792_s15 = smov %s673_s18  ;;  %15 = sbr.rel (!%p13_p11) target bundleno = 3 (0x3), region = 116 }
 0x1cf   :  { %448 = vsyncpa [#allocation4], 1 }
 0x1d0   :  { %450 = vsyncpa [#allocation4 + $0x1], 1 }

</bundles_post_ra>
